<compile_context>
chip_gen: v5e
topology: v5e:2x2
jax: 0.10.0
libtpu: 0.0.40
codegen_flags: <defaults>
</compile_context>

<pallas_src>
import functools
import math

import jax
import jax.numpy as jnp
from jax.experimental import pallas as pl
from jax.experimental.pallas import tpu as pltpu


_LANE = 128


def _logit(p, eps=1e-8):
    p = min(max(float(p), eps), 1.0 - eps)
    return math.log(p) - math.log1p(-p)


# ---------------------------------------------------------------------------
# Kernels (elementwise over a (block_rows, last) VMEM tile).
# ---------------------------------------------------------------------------

def _spike_hard_kernel(u_ref, o_ref, *, neg_u0, flip):
    # sigmoid((u + u0) * td) > 0.5  <=>  u > -u0 (td > 0) / u < -u0 (td < 0).
    # Compare in f32 so a bf16-rounded threshold can't shift ties; the convert
    # is VPU work and free under the memory roofline.
    u = u_ref[...].astype(jnp.float32)
    z = (u < neg_u0) if flip else (u > neg_u0)
    o_ref[...] = z.astype(o_ref.dtype)


def _spike_soft_kernel(u_ref, o_ref, *, u0, half_td):
    # binary=False: probabilities. Single EUP op: sigmoid(x) = 0.5*tanh(x/2)+0.5.
    # Compute in the input dtype (bf16 EUP/VPU are native on v6e/v7x; Mosaic
    # widens internally on v5e).
    u = u_ref[...]
    x = (u + u0) * half_td            # weakly-typed Python floats keep u.dtype
    o_ref[...] = (0.5 * jnp.tanh(x) + 0.5).astype(o_ref.dtype)


# ---------------------------------------------------------------------------
# Layout / tiling helpers.
# ---------------------------------------------------------------------------

def _lane_dense_layout(n):
    """Widest last dim (multiple of 128, <= 1024) dividing n. n must be a
    multiple of 128."""
    assert n % _LANE == 0
    for last in (1024, 512, 384, 256, 128):
        if n % last == 0:
            return n // last, last
    return n // _LANE, _LANE


def _sublane_multiple(itemsize):
    # Packed vreg sublane tile: 8 for f32, 16 for bf16, 32 for int8/fp8.
    return 8 * max(1, 4 // itemsize)


def _pick_block_rows(rows, last, itemsize, target_bytes=2 << 20):
    """~2 MiB blocks (x2 double-buffer x (in+out) ~= 8 MiB VMEM), rounded to
    the dtype's sublane packing, capped so the grid keeps >= ~8 steps (v7x's
    two TensorCores each get >= ~4 pipelined steps)."""
    sub = _sublane_multiple(itemsize)
    if rows <= sub:
        return rows
    tr = max(sub, (target_bytes // (last * itemsize)) // sub * sub)
    cap = ((rows + 7) // 8 + sub - 1) // sub * sub      # >= ~8 grid steps
    tr = min(tr, max(cap, sub))
    return min(tr, rows)


def _run_elementwise(kernel, x2d, out_dtype, trans_per_elem):
    rows, last = x2d.shape
    n = rows * last
    tr = _pick_block_rows(rows, last, x2d.dtype.itemsize)
    grid = (pl.cdiv(rows, tr),)
    cost = pl.CostEstimate(
        flops=2 * n,
        transcendentals=trans_per_elem * n,
        bytes_accessed=n * (x2d.dtype.itemsize + jnp.dtype(out_dtype).itemsize),
    )
    return pl.pallas_call(
        kernel,
        out_shape=jax.ShapeDtypeStruct((rows, last), out_dtype),
        grid=grid,
        in_specs=[pl.BlockSpec((tr, last), lambda i: (i, 0))],
        out_specs=pl.BlockSpec((tr, last), lambda i: (i, 0)),
        compiler_params=pltpu.CompilerParams(
            dimension_semantics=("parallel",),
            vmem_limit_bytes=32 << 20),
        cost_estimate=cost,
    )(x2d)


def _xla_spike(u, *, u0, td, binary, out_dtype):
    """Fused XLA elementwise fallback (tiny tensors / ragged tails)."""
    if binary:
        if td > 0:
            return (u.astype(jnp.float32) > -u0).astype(out_dtype)
        if td < 0:
            return (u.astype(jnp.float32) < -u0).astype(out_dtype)
        return jnp.zeros(u.shape, out_dtype)
    x = (u.astype(jnp.float32) + u0) * td
    return jax.nn.sigmoid(x).astype(out_dtype)


# ---------------------------------------------------------------------------
# Public wrapper (mirrors SpikeDefault.forward).
# ---------------------------------------------------------------------------

def spike_default(u, hidden=None, *, temp_noise=0.0, temp_derivative=1.0,
                  prob_at_zero=0.5, binary=True, out_dtype=None,
                  force_pallas=False, min_pallas_elements=1 << 20):
    """Pallas implementation of SpikeDefault.forward(u, hidden)."""
    del hidden  # unused by the PyTorch forward
    if temp_noise != 0.0:
        # TODO(synk): gumbel-noise path needs in-kernel PRNG (pltpu.prng_seed /
        # pltpu.prng_random_bits) with a per-block seed derived from
        # pl.program_id so tiles don't repeat noise — not implemented here.
        raise NotImplementedError("temp_noise != 0.0 not supported")

    u0 = _logit(prob_at_zero)
    td = float(temp_derivative)
    # Note: PyTorch's hard path nominally returns float32; default mirrors
    # u.dtype (0/1 exact in bf16/int8 too). Pass out_dtype= to narrow the
    # spike output and cut HBM write traffic.
    out_dtype = jnp.dtype(u.dtype if out_dtype is None else out_dtype)
    n = math.prod(u.shape) if u.shape else 1

    if binary and td == 0.0:
        return jnp.zeros(u.shape, out_dtype)   # sigmoid(0) == 0.5, never > 0.5

    # Small tensors: a standalone pallas_call can't fuse with its producer/
    # consumer and launch + per-step overhead dominates — let XLA fuse it.
    if not force_pallas and n < min_pallas_elements:
        return _xla_spike(u, u0=u0, td=td, binary=binary, out_dtype=out_dtype)

    if binary:
        kernel = functools.partial(_spike_hard_kernel, neg_u0=-u0, flip=td < 0)
        trans_per_elem = 0
    else:
        kernel = functools.partial(_spike_soft_kernel, u0=u0, half_td=0.5 * td)
        trans_per_elem = 1

    flat = u.reshape(-1)
    n_main = (n // _LANE) * _LANE

    if n_main == n:
        rows, last = _lane_dense_layout(n)
        out2d = _run_elementwise(kernel, flat.reshape(rows, last),
                                 out_dtype, trans_per_elem)
        return out2d.reshape(u.shape)

    if n_main == 0:
        return _xla_spike(u, u0=u0, td=td, binary=binary, out_dtype=out_dtype)

    # Ragged case: Pallas on the 128-aligned prefix, fused XLA on the <128-elem
    # tail — avoids the pad + slice-back full-tensor copies of the old path.
    rows, last = _lane_dense_layout(n_main)
    head = _run_elementwise(kernel, flat[:n_main].reshape(rows, last),
                            out_dtype, trans_per_elem)
    tail = _xla_spike(flat[n_main:], u0=u0, td=td, binary=binary,
                      out_dtype=out_dtype)
    return jnp.concatenate([head.reshape(-1), tail]).reshape(u.shape)


if __name__ == "__main__":
    key = jax.random.PRNGKey(0)
    k_u, k_h = jax.random.split(key)

    # Small membrane-potential tensor, NCHW: batch=2, channels=4, 16x16.
    u = jax.random.normal(k_u, (2, 4, 16, 16), dtype=jnp.float32)
    hidden = jax.random.normal(k_h, (2, 4, 16, 16), dtype=jnp.float32)  # unused

    # Hard (binary=True) path — force the Pallas kernel even at this tiny size.
    z = spike_default(u, hidden, force_pallas=True)
    z = jax.block_until_ready(z)
    z_ref = (jax.nn.sigmoid(u) > 0.5).astype(jnp.float32)
    assert z.shape == u.shape and z.dtype == u.dtype
    assert jnp.array_equal(z, z_ref), "hard-path mismatch vs reference"

    # Soft (binary=False) path.
    p = spike_default(u, hidden, binary=False, force_pallas=True)
    p = jax.block_until_ready(p)
    p_ref = jax.nn.sigmoid(u)
    assert jnp.allclose(p, p_ref, atol=1e-5), "soft-path mismatch vs reference"

    # Non-default temperature / prob_at_zero (hard path, nonzero threshold).
    z2 = spike_default(u, hidden, temp_derivative=2.0, prob_at_zero=0.3,
                       force_pallas=True)
    z2 = jax.block_until_ready(z2)
    u0 = _logit(0.3)
    z2_ref = (jax.nn.sigmoid((u + u0) * 2.0) > 0.5).astype(jnp.float32)
    assert jnp.array_equal(z2, z2_ref), "hard-path (td=2, p0=0.3) mismatch"

    # Ragged-tail path (n not a multiple of 128): Pallas prefix + XLA tail.
    k_r = jax.random.PRNGKey(1)
    ur = jax.random.normal(k_r, (200,), dtype=jnp.float32)
    zr = spike_default(ur, None, force_pallas=True)
    zr = jax.block_until_ready(zr)
    zr_ref = (jax.nn.sigmoid(ur) > 0.5).astype(jnp.float32)
    assert jnp.array_equal(zr, zr_ref), "ragged-tail mismatch vs reference"

    print("KERNEL_OK")
</pallas_src>

<mosaic_0001>
module attributes {stable_mosaic.version = 11 : i64} {
  func.func @_spike_hard_kernel(%arg0: i32, %arg1: memref<2x1024xf32, #tpu.memory_space<vmem>>, %arg2: memref<2x1024xf32, #tpu.memory_space<vmem>>) attributes {dimension_semantics = [#tpu.dimension_semantics<parallel>], iteration_bounds = array<i64: 1>, scalar_prefetch = 0 : i64, scratch_operands = 0 : i64, tpu.core_type = #tpu.core_type<tc>, window_params = [{transform_indices = @transform_0, window_bounds = array<i64: 2, 1024>}, {transform_indices = @transform_1, window_bounds = array<i64: 2, 1024>}]} {
    %c0 = arith.constant 0 : index
    %c0_0 = arith.constant 0 : index
    %0 = vector.load %arg1[%c0, %c0_0] : memref<2x1024xf32, #tpu.memory_space<vmem>>, vector<2x1024xf32>
    %cst = arith.constant -0.000000e+00 : f32
    %1 = vector.broadcast %cst : f32 to vector<2x1024xf32>
    %2 = arith.cmpf ogt, %0, %1 : vector<2x1024xf32>
    %3 = arith.extui %2 : vector<2x1024xi1> to vector<2x1024xi32>
    %4 = arith.sitofp %3 : vector<2x1024xi32> to vector<2x1024xf32>
    %c0_1 = arith.constant 0 : index
    %c0_2 = arith.constant 0 : index
    %5 = vector.load %arg2[%c0_1, %c0_2] : memref<2x1024xf32, #tpu.memory_space<vmem>>, vector<2x1024xf32>
    tpu.vector_store %arg2[%c0_1, %c0_2], %4 {strides = array<i32>} : memref<2x1024xf32, #tpu.memory_space<vmem>>, vector<2x1024xf32>,
    return
  }
  func.func @transform_0(%arg0: i32) -> (i32, i32) {
    %c0_i32 = arith.constant 0 : i32
    %c0_i32_0 = arith.constant 0 : i32
    return %arg0, %c0_i32 : i32, i32
  }
  func.func @transform_1(%arg0: i32) -> (i32, i32) {
    %c0_i32 = arith.constant 0 : i32
    %c0_i32_0 = arith.constant 0 : i32
    return %arg0, %c0_i32 : i32, i32
  }
}

</mosaic_0001>

<bundles_post_ra>
// kernel: tpu_custom_call.1
= control target key start
LH: loop header
LB: loop body
LE: loop exit
PB: predicated region body
PF: predicated region fallthrough
CT: control target
= control target key end

     0   :  { %6 = vsyncpa [#allocation3], 0  ;;  %s126_s0 = inlined_call_operand.hbm [shape: f32[2,1024], index: 0, kind: input, shape index: {}]   ;;  %s127_s1 = inlined_call_operand.hbm [shape: f32[2,1024], index: 1, kind: output, shape index: {}]  }
   0x1   :  { %7 = vsyncpa [#allocation4], 0  ;;  %s13_s8 = sshll.u32 %s126_s0, 4  ;;  %s107_s9 = smov [#allocation2]   ;;  %s14_s8 = int_to_ptr.hbm [resolvable:$true] %s13_s8 }
   0x2   :  { %s15_s10 = sshll.u32 %s107_s9, 4  ;;  %s16_s10 = int_to_ptr.vmem [resolvable:$true] %s15_s10 }
   0x3   :  { %18 = dma.hbm_to_vmem [thread:$0]  %s14_s8, 256, %s16_s10, [#allocation3]  }
   0x4   :  { %103 = dma.done.wait [#allocation3], 256  }
   0x5   :  { %104 = vsyncadd [#allocation3], 4294967040  ;;  %s108_s11 = smov [#allocation5]   ;;  %s40_s15 = sshll.u32 %s127_s1, 4  ;;  %v23_v0 = vld [vmem:[#allocation2] sm:$0xff]  ;;  %v24_v1 = vld [vmem:[#allocation2 + $0x8] sm:$0xff]  ;;  %s41_s15 = int_to_ptr.hbm [resolvable:$true] %s40_s15 }
   0x6   :  { %s38_s12 = sshll.u32 %s108_s11, 4  ;;  %vm25_vm0 = vcmp.gt.f32.partialorder %v23_v0, -0.0  ;;  %vm26_vm1 = vcmp.gt.f32.partialorder %v24_v1, -0.0  ;;  %v109_v2 = vmov 0.0   ;;  %s39_s12 = int_to_ptr.vmem [resolvable:$true] %s38_s12 }
   0x7   :  { %v50_v3 = vsel %vm25_vm0, 1.0, %v109_v2  ;;  %v51_v4 = vsel %vm26_vm1, 1.0, %v109_v2 }
   0x8   :  { %31 = vst [vmem:[#allocation5] sm:$0xff] %v50_v3 }
   0x9   :  { %32 = vst [vmem:[#allocation5 + $0x8] sm:$0xff] %v51_v4 }
   0xa   :  { %43 = dma.vmem_to_hbm [thread:$0]  %s39_s12, 256, %s41_s15, [#allocation4]  }
   0xb   :  { %105 = dma.done.wait [#allocation4], 256  }
   0xc   :  { %106 = vsyncadd [#allocation4], 4294967040 }
   0xd   :  { %48 = vsyncpa [#allocation3], 1 }
   0xe   :  { %49 = vsyncpa [#allocation4], 1 }

</bundles_post_ra>
